<compile_context>
chip_gen: v5e
topology: v5e:2x2
jax: 0.10.0
libtpu: 0.0.40
codegen_flags: <defaults>
</compile_context>

<pallas_src>
import math
import functools

import jax
import jax.numpy as jnp
from jax.experimental import pallas as pl
from jax.experimental.pallas import tpu as pltpu

_LANE = 128     # TPU lane width (last dim)
_SUBLANE = 8    # f32 sublane width (second-to-last dim)
_MAX_TM = 256   # batch tile cap (keeps vreg pressure bounded; review P-guide)


def _round_up(n, m):
    return ((n + m - 1) // m) * m


# ----------------------------------------------------------------------------
# One-time parameter preparation: transpose to (in, out) and zero-pad to lanes.
# Done ONCE, outside the forward path.
# ----------------------------------------------------------------------------
def prepare_params(params):
    """params: list of (W, b), W shaped (out_features, in_features) (nn.Linear).

    Returns (flat_wb, dims):
      flat_wb: tuple (W1p, b1p, W2p, b2p, ...) with Wlp shaped (in_p, out_p),
               blp shaped (1, out_p), zero-padded.
      dims:    tuple of (in_f, out_f, in_p, out_p) per layer (static metadata).
    """
    flat, dims = [], []
    for (W, b) in params:
        out_f, in_f = W.shape
        in_p = _round_up(in_f, _LANE)
        out_p = _round_up(out_f, _LANE)
        # Pre-transpose to (in, out): kernel does x @ W with no in-kernel XLU transpose.
        # Padded rows/cols are ZERO -- required for exactness (see header note).
        Wp = jnp.zeros((in_p, out_p), W.dtype).at[:in_f, :out_f].set(W.T)
        bp = jnp.zeros((1, out_p), b.dtype).at[0, :out_f].set(b)
        flat += [Wp, bp]
        dims.append((in_f, out_f, in_p, out_p))
    return tuple(flat), tuple(dims)


# ----------------------------------------------------------------------------
# Single fused kernel: whole MLP forward for one batch tile, weights VMEM-resident.
# ----------------------------------------------------------------------------
def _fused_mlp_kernel(*refs, num_layers: int):
    # refs = (x_ref, w1_ref, b1_ref, ..., wL_ref, bL_ref, o_ref)
    x_ref = refs[0]
    o_ref = refs[-1]
    wb_refs = refs[1:-1]

    h = x_ref[...]
    for l in range(num_layers):
        w = wb_refs[2 * l][...]
        b = wb_refs[2 * l + 1][...]
        h = jnp.dot(h, w, preferred_element_type=jnp.float32) + b   # MXU + VPU
        if l + 1 < num_layers:
            h = jax.nn.sigmoid(h)                                   # EUP transcendental
    o_ref[...] = h.astype(o_ref.dtype)


# ----------------------------------------------------------------------------
# Jitted, cached forward builder (per static layer dims / batch / dtype).
# ----------------------------------------------------------------------------
@functools.lru_cache(maxsize=None)
def _get_forward(dims, batch, dtype_name):
    num_layers = len(dims)
    in_f, _, in_p, _ = dims[0]
    _, out_f, _, out_p = dims[-1]
    dtype = jnp.dtype(dtype_name)

    # Batch tile: cap at _MAX_TM (vreg pressure), sublane-aligned.
    # NOTE: at tiny batches the MXU rows are mostly wasted; this kernel only
    # pays off compute-wise at B >= 128 (v5e) / 256 (v6e/v7x).
    TM = min(_MAX_TM, _round_up(max(batch, _SUBLANE), _SUBLANE))
    Bp = _round_up(max(batch, TM), TM)
    grid = (Bp // TM,)

    # VMEM budget: resident weights + double-buffered activation tiles + margin.
    weight_bytes = sum(4 * ip * op + 4 * op for (_, _, ip, op) in dims)
    act_bytes = 2 * TM * (in_p + out_p) * 4          # double-buffered x / out tiles
    vmem_limit = min(_round_up(weight_bytes + act_bytes + (4 << 20), 1 << 20), 64 << 20)

    # Cost estimate so XLA schedules neighbors around the custom call.
    flops = 2 * Bp * sum(ip * op for (_, _, ip, op) in dims)
    transcendentals = Bp * sum(op for (_, _, _, op) in dims[:-1])
    bytes_accessed = (Bp * in_p + Bp * out_p) * 4 + weight_bytes
    cost = pl.CostEstimate(flops=flops, transcendentals=transcendentals,
                           bytes_accessed=bytes_accessed)

    # BlockSpecs: batch-tiled x/out; weights/biases constant (VMEM-resident).
    in_specs = [pl.BlockSpec((TM, in_p), lambda i: (i, 0))]
    for (_, _, ip, op) in dims:
        in_specs.append(pl.BlockSpec((ip, op), lambda i: (0, 0)))
        in_specs.append(pl.BlockSpec((1, op), lambda i: (0, 0)))
    out_spec = pl.BlockSpec((TM, out_p), lambda i: (i, 0))

    kernel = functools.partial(_fused_mlp_kernel, num_layers=num_layers)

    call = pl.pallas_call(
        kernel,
        out_shape=jax.ShapeDtypeStruct((Bp, out_p), dtype),
        grid=grid,
        in_specs=in_specs,
        out_specs=out_spec,
        compiler_params=pltpu.CompilerParams(
            dimension_semantics=("parallel",),
            vmem_limit_bytes=vmem_limit,
        ),
        cost_estimate=cost,
    )

    @jax.jit
    def fwd(x, *flat_wb):
        # Zero-pad batch and input features (cheap: one pad op, fused by XLA).
        xp = jnp.zeros((Bp, in_p), x.dtype).at[:x.shape[0], :in_f].set(x)
        y_padded = call(xp, *flat_wb)
        return y_padded[:x.shape[0], :out_f]

    return fwd


def net_forward(x, prepared):
    """Forward pass of Net. `prepared` is the output of prepare_params(params)."""
    flat_wb, dims = prepared
    fwd = _get_forward(dims, x.shape[0], jnp.dtype(x.dtype).name)
    return fwd(x, *flat_wb)


# ----------------------------------------------------------------------------
# Parameter init matching nn.Linear.reset_parameters / Net.init_params
# ----------------------------------------------------------------------------
def init_net_params(key, layer_sizes):
    params = []
    for l in range(len(layer_sizes) - 1):
        fan_in, fan_out = layer_sizes[l], layer_sizes[l + 1]
        key, kw, kb = jax.random.split(key, 3)
        # kaiming_uniform_(a=sqrt(5)) -> bound = 1/sqrt(fan_in)
        bound = 1.0 / math.sqrt(fan_in)
        W = jax.random.uniform(kw, (fan_out, fan_in), jnp.float32, -bound, bound)
        b = jax.random.uniform(kb, (fan_out,), jnp.float32, -bound, bound)
        params.append((W, b))
    return params


# Pure-JAX reference for the sanity check
def net_forward_ref(x, params):
    hidden = x
    n_layers = len(params)
    for l, (W, b) in enumerate(params):
        hidden = hidden @ W.T + b
        if (l + 1) < n_layers:
            hidden = jax.nn.sigmoid(hidden)
    return hidden


if __name__ == "__main__":
    # layer_sizes = [in, hidden1, hidden2, out]
    layer_sizes = [32, 64, 32, 8]
    batch = 4

    key = jax.random.PRNGKey(0)
    key, kx = jax.random.split(key)
    x = jax.random.normal(kx, (batch, layer_sizes[0]), jnp.float32)

    params = init_net_params(key, layer_sizes)
    prepared = prepare_params(params)   # one-time pad/transpose (hoisted out of forward)

    y = net_forward(x, prepared)
    y = jax.block_until_ready(y)

    y_ref = net_forward_ref(x, params)
    assert y.shape == (batch, layer_sizes[-1])
    assert jnp.allclose(y, y_ref, atol=1e-5, rtol=1e-5)

    print("KERNEL_OK")
</pallas_src>

<mosaic_0001>
module attributes {stable_mosaic.version = 11 : i64} {
  func.func @_fused_mlp_kernel(%arg0: i32, %arg1: memref<8x128xf32, #tpu.memory_space<vmem>>, %arg2: memref<128x128xf32, #tpu.memory_space<vmem>>, %arg3: memref<1x128xf32, #tpu.memory_space<vmem>>, %arg4: memref<128x128xf32, #tpu.memory_space<vmem>>, %arg5: memref<1x128xf32, #tpu.memory_space<vmem>>, %arg6: memref<128x128xf32, #tpu.memory_space<vmem>>, %arg7: memref<1x128xf32, #tpu.memory_space<vmem>>, %arg8: memref<8x128xf32, #tpu.memory_space<vmem>>) attributes {dimension_semantics = [#tpu.dimension_semantics<parallel>], iteration_bounds = array<i64: 1>, scalar_prefetch = 0 : i64, scratch_operands = 0 : i64, tpu.core_type = #tpu.core_type<tc>, window_params = [{transform_indices = @transform_0, window_bounds = array<i64: 8, 128>}, {pipeline_mode = #tpu.pipeline_mode<synchronous>, transform_indices = @transform_1, window_bounds = array<i64: 128, 128>}, {pipeline_mode = #tpu.pipeline_mode<synchronous>, transform_indices = @transform_2, window_bounds = array<i64: 1, 128>}, {pipeline_mode = #tpu.pipeline_mode<synchronous>, transform_indices = @transform_3, window_bounds = array<i64: 128, 128>}, {pipeline_mode = #tpu.pipeline_mode<synchronous>, transform_indices = @transform_4, window_bounds = array<i64: 1, 128>}, {pipeline_mode = #tpu.pipeline_mode<synchronous>, transform_indices = @transform_5, window_bounds = array<i64: 128, 128>}, {pipeline_mode = #tpu.pipeline_mode<synchronous>, transform_indices = @transform_6, window_bounds = array<i64: 1, 128>}, {transform_indices = @transform_7, window_bounds = array<i64: 8, 128>}]} {
    %c0 = arith.constant 0 : index
    %c0_0 = arith.constant 0 : index
    %0 = vector.load %arg1[%c0, %c0_0] : memref<8x128xf32, #tpu.memory_space<vmem>>, vector<8x128xf32>
    %c0_1 = arith.constant 0 : index
    %c0_2 = arith.constant 0 : index
    %1 = vector.load %arg2[%c0_1, %c0_2] : memref<128x128xf32, #tpu.memory_space<vmem>>, vector<128x128xf32>
    %c0_3 = arith.constant 0 : index
    %c0_4 = arith.constant 0 : index
    %2 = vector.load %arg3[%c0_3, %c0_4] : memref<1x128xf32, #tpu.memory_space<vmem>>, vector<1x128xf32>
    %cst = arith.constant dense<0.000000e+00> : vector<8x128xf32>
    %3 = tpu.matmul %0, %1, %cst {dimension_numbers = #tpu.dot_dimension_numbers<[1], [0], [0], [1], [0, 0, 1, 1], [], []>} : vector<8x128xf32>, vector<128x128xf32>, vector<8x128xf32> -> vector<8x128xf32>
    %4 = vector.broadcast %2 : vector<1x128xf32> to vector<8x128xf32>
    %5 = arith.addf %3, %4 : vector<8x128xf32>
    %6 = arith.negf %5 : vector<8x128xf32>
    %7 = math.exp %6 : vector<8x128xf32>
    %cst_5 = arith.constant 1.000000e+00 : f32
    %8 = vector.broadcast %cst_5 : f32 to vector<8x128xf32>
    %9 = arith.addf %8, %7 : vector<8x128xf32>
    %10 = arith.divf %8, %9 : vector<8x128xf32>
    %c0_6 = arith.constant 0 : index
    %c0_7 = arith.constant 0 : index
    %11 = vector.load %arg4[%c0_6, %c0_7] : memref<128x128xf32, #tpu.memory_space<vmem>>, vector<128x128xf32>
    %c0_8 = arith.constant 0 : index
    %c0_9 = arith.constant 0 : index
    %12 = vector.load %arg5[%c0_8, %c0_9] : memref<1x128xf32, #tpu.memory_space<vmem>>, vector<1x128xf32>
    %cst_10 = arith.constant dense<0.000000e+00> : vector<8x128xf32>
    %13 = tpu.matmul %10, %11, %cst_10 {dimension_numbers = #tpu.dot_dimension_numbers<[1], [0], [0], [1], [0, 0, 1, 1], [], []>} : vector<8x128xf32>, vector<128x128xf32>, vector<8x128xf32> -> vector<8x128xf32>
    %14 = vector.broadcast %12 : vector<1x128xf32> to vector<8x128xf32>
    %15 = arith.addf %13, %14 : vector<8x128xf32>
    %16 = arith.negf %15 : vector<8x128xf32>
    %17 = math.exp %16 : vector<8x128xf32>
    %cst_11 = arith.constant 1.000000e+00 : f32
    %18 = vector.broadcast %cst_11 : f32 to vector<8x128xf32>
    %19 = arith.addf %18, %17 : vector<8x128xf32>
    %20 = arith.divf %18, %19 : vector<8x128xf32>
    %c0_12 = arith.constant 0 : index
    %c0_13 = arith.constant 0 : index
    %21 = vector.load %arg6[%c0_12, %c0_13] : memref<128x128xf32, #tpu.memory_space<vmem>>, vector<128x128xf32>
    %c0_14 = arith.constant 0 : index
    %c0_15 = arith.constant 0 : index
    %22 = vector.load %arg7[%c0_14, %c0_15] : memref<1x128xf32, #tpu.memory_space<vmem>>, vector<1x128xf32>
    %cst_16 = arith.constant dense<0.000000e+00> : vector<8x128xf32>
    %23 = tpu.matmul %20, %21, %cst_16 {dimension_numbers = #tpu.dot_dimension_numbers<[1], [0], [0], [1], [0, 0, 1, 1], [], []>} : vector<8x128xf32>, vector<128x128xf32>, vector<8x128xf32> -> vector<8x128xf32>
    %24 = vector.broadcast %22 : vector<1x128xf32> to vector<8x128xf32>
    %25 = arith.addf %23, %24 : vector<8x128xf32>
    %c0_17 = arith.constant 0 : index
    %c0_18 = arith.constant 0 : index
    %26 = vector.load %arg8[%c0_17, %c0_18] : memref<8x128xf32, #tpu.memory_space<vmem>>, vector<8x128xf32>
    tpu.vector_store %arg8[%c0_17, %c0_18], %25 {strides = array<i32>} : memref<8x128xf32, #tpu.memory_space<vmem>>, vector<8x128xf32>,
    return
  }
  func.func @transform_0(%arg0: i32) -> (i32, i32) {
    %c0_i32 = arith.constant 0 : i32
    %c0_i32_0 = arith.constant 0 : i32
    return %arg0, %c0_i32 : i32, i32
  }
  func.func @transform_1(%arg0: i32) -> (i32, i32) {
    %c0_i32 = arith.constant 0 : i32
    %c0_i32_0 = arith.constant 0 : i32
    %c0_i32_1 = arith.constant 0 : i32
    return %c0_i32, %c0_i32_0 : i32, i32
  }
  func.func @transform_2(%arg0: i32) -> (i32, i32) {
    %c0_i32 = arith.constant 0 : i32
    %c0_i32_0 = arith.constant 0 : i32
    %c0_i32_1 = arith.constant 0 : i32
    return %c0_i32, %c0_i32_0 : i32, i32
  }
  func.func @transform_3(%arg0: i32) -> (i32, i32) {
    %c0_i32 = arith.constant 0 : i32
    %c0_i32_0 = arith.constant 0 : i32
    %c0_i32_1 = arith.constant 0 : i32
    return %c0_i32, %c0_i32_0 : i32, i32
  }
  func.func @transform_4(%arg0: i32) -> (i32, i32) {
    %c0_i32 = arith.constant 0 : i32
    %c0_i32_0 = arith.constant 0 : i32
    %c0_i32_1 = arith.constant 0 : i32
    return %c0_i32, %c0_i32_0 : i32, i32
  }
  func.func @transform_5(%arg0: i32) -> (i32, i32) {
    %c0_i32 = arith.constant 0 : i32
    %c0_i32_0 = arith.constant 0 : i32
    %c0_i32_1 = arith.constant 0 : i32
    return %c0_i32, %c0_i32_0 : i32, i32
  }
  func.func @transform_6(%arg0: i32) -> (i32, i32) {
    %c0_i32 = arith.constant 0 : i32
    %c0_i32_0 = arith.constant 0 : i32
    %c0_i32_1 = arith.constant 0 : i32
    return %c0_i32, %c0_i32_0 : i32, i32
  }
  func.func @transform_7(%arg0: i32) -> (i32, i32) {
    %c0_i32 = arith.constant 0 : i32
    %c0_i32_0 = arith.constant 0 : i32
    return %arg0, %c0_i32 : i32, i32
  }
}

</mosaic_0001>

<bundles_post_ra>
// kernel: fwd.1
= control target key start
LH: loop header
LB: loop body
LE: loop exit
PB: predicated region body
PF: predicated region fallthrough
CT: control target
= control target key end

     0   :  { %12 = vsyncpa [#allocation3], 0  ;;  %s402_s0 = inlined_call_operand.vmem [shape: f32[8,128], index: 0, kind: input, shape index: {}]   ;;  %s403_s1 = inlined_call_operand.hbm [shape: f32[128,128], index: 1, kind: input, shape index: {}]   ;;  %s404_s2 = inlined_call_operand.vmem [shape: f32[1,128], index: 2, kind: input, shape index: {}]   ;;  %s405_s3 = inlined_call_operand.hbm [shape: f32[128,128], index: 3, kind: input, shape index: {}]   ;;  %s406_s4 = inlined_call_operand.vmem [shape: f32[1,128], index: 4, kind: input, shape index: {}]   ;;  %s407_s5 = inlined_call_operand.hbm [shape: f32[128,128], index: 5, kind: input, shape index: {}]   ;;  %s408_s6 = inlined_call_operand.vmem [shape: f32[1,128], index: 6, kind: input, shape index: {}]   ;;  %s409_s7 = inlined_call_operand.vmem [shape: f32[8,128], index: 7, kind: output, shape index: {}]  }
   0x1   :  { %13 = vsyncpa [#allocation5], 0  ;;  %s35_s26 = sshll.u32 %s405_s3, 4  ;;  %s333_s27 = smov [#allocation4]   ;;  %s36_s26 = int_to_ptr.hbm [resolvable:$true] %s35_s26 }
   0x2   :  { %s37_s28 = sshll.u32 %s333_s27, 4  ;;  %s20_s8 = sshll.u32 %s403_s1, 4  ;;  %s38_s28 = int_to_ptr.vmem [resolvable:$true] %s37_s28  ;;  %s21_s8 = int_to_ptr.hbm [resolvable:$true] %s20_s8 }
   0x3   :  { %s334_s9 = smov 128   ;;  %s335_s10 = smov 8  }
   0x4   :  { %43 = dma.hbm_to_vmem [thread:$0]  %s36_s26, 2048, %s38_s28, [#allocation5], %s334_s9, %s334_s9, %s335_s10  }
   0x5   :  { %s336_s11 = smov [#allocation2]   ;;  %s50_s15 = sshll.u32 %s407_s5, 4  ;;  %s51_s15 = int_to_ptr.hbm [resolvable:$true] %s50_s15 }
   0x6   :  { %s22_s12 = sshll.u32 %s336_s11, 4  ;;  %s337_s3 = smov [#allocation6]   ;;  %s23_s12 = int_to_ptr.vmem [resolvable:$true] %s22_s12 }
   0x7   :  { %28 = dma.hbm_to_vmem [thread:$0]  %s21_s8, 2048, %s23_s12, [#allocation3], %s334_s9, %s334_s9, %s335_s10  }
   0x8   :  { %s52_s16 = sshll.u32 %s337_s3, 4  ;;  %s53_s16 = int_to_ptr.vmem [resolvable:$true] %s52_s16 }
   0x9   :  { %58 = dma.hbm_to_vmem [thread:$0]  %s51_s15, 2048, %s53_s16, [#allocation5], %s334_s9, %s334_s9, %s335_s10  }
   0xa   :  { %329 = dma.done.wait [#allocation3], 2048  }
   0xb   :  { %330 = vsyncadd [#allocation3], 4294965248 }
   0xc   :  { %331 = dma.done.wait [#allocation5], 4096  }
   0xd   :  { %332 = vsyncadd [#allocation5], 4294963200  ;;  %v89_v0 = vld [vmem:[#allocation2 + $0x78] sm:$0xff]  ;;  %v88_v1 = vld [vmem:[#allocation2 + $0x70] sm:$0xff] }
   0xe   :  { %94 = vmatpush.msra.mxu0 %v89_v0  ;;  %v87_v2 = vld [vmem:[#allocation2 + $0x68] sm:$0xff]  ;;  %v86_v3 = vld [vmem:[#allocation2 + $0x60] sm:$0xff]  ;;  %v85_v4 = vld [vmem:[#allocation2 + $0x58] sm:$0xff] }
   0xf   :  { %v84_v5 = vld [vmem:[#allocation2 + $0x50] sm:$0xff]  ;;  %v83_v6 = vld [vmem:[#allocation2 + $0x48] sm:$0xff]  ;;  %v82_v7 = vld [vmem:[#allocation2 + $0x40] sm:$0xff] }
  0x10   :  { %95 = vmatpush.msra.mxu0 %v88_v1  ;;  %v81_v8 = vld [vmem:[#allocation2 + $0x38] sm:$0xff]  ;;  %v80_v9 = vld [vmem:[#allocation2 + $0x30] sm:$0xff]  ;;  %v79_v10 = vld [vmem:[#allocation2 + $0x28] sm:$0xff] }
  0x11   :  { %v78_v11 = vld [vmem:[#allocation2 + $0x20] sm:$0xff]  ;;  %v77_v12 = vld [vmem:[#allocation2 + $0x18] sm:$0xff]  ;;  %v76_v13 = vld [vmem:[#allocation2 + $0x10] sm:$0xff] }
  0x12   :  { %96 = vmatpush.msra.mxu0 %v87_v2  ;;  %v75_v14 = vld [vmem:[#allocation2 + $0x8] sm:$0xff]  ;;  %v74_v15 = vld [vmem:[#allocation2] sm:$0xff]  ;;  %v148_v17 = vld [vmem:[#allocation4 + $0x78] sm:$0xff] }
  0x13   :  { %v73_v16 = vld [vmem:[%s402_s0] sm:$0xff]  ;;  %153 = vmatpush.msra.mxu1 %v148_v17  ;;  %v147_v18 = vld [vmem:[#allocation4 + $0x70] sm:$0xff]  ;;  %v146_v19 = vld [vmem:[#allocation4 + $0x68] sm:$0xff] }
  0x14   :  { %97 = vmatpush.msra.mxu0 %v86_v3  ;;  %v145_v20 = vld [vmem:[#allocation4 + $0x60] sm:$0xff]  ;;  %v144_v21 = vld [vmem:[#allocation4 + $0x58] sm:$0xff]  ;;  %v143_v22 = vld [vmem:[#allocation4 + $0x50] sm:$0xff] }
  0x15   :  { %154 = vmatpush.msra.mxu1 %v147_v18  ;;  %v142_v23 = vld [vmem:[#allocation4 + $0x48] sm:$0xff]  ;;  %v141_v24 = vld [vmem:[#allocation4 + $0x40] sm:$0xff]  ;;  %v140_v25 = vld [vmem:[#allocation4 + $0x38] sm:$0xff] }
  0x16   :  { %98 = vmatpush.msra.mxu0 %v85_v4  ;;  %v139_v26 = vld [vmem:[#allocation4 + $0x30] sm:$0xff]  ;;  %v138_v27 = vld [vmem:[#allocation4 + $0x28] sm:$0xff]  ;;  %v137_v28 = vld [vmem:[#allocation4 + $0x20] sm:$0xff] }
  0x17   :  { %155 = vmatpush.msra.mxu1 %v146_v19  ;;  %v136_v29 = vld [vmem:[#allocation4 + $0x18] sm:$0xff]  ;;  %v135_v30 = vld [vmem:[#allocation4 + $0x10] sm:$0xff]  ;;  %v134_v31 = vld [vmem:[#allocation4 + $0x8] sm:$0xff] }
  0x18   :  { %99 = vmatpush.msra.mxu0 %v84_v5  ;;  %v133_v32 = vld [vmem:[#allocation4] sm:$0xff]  ;;  %v207_v49 = vld [vmem:[#allocation6 + $0x78] sm:$0xff]  ;;  %v206_v50 = vld [vmem:[#allocation6 + $0x70] sm:$0xff] }
  0x19   :  { %156 = vmatpush.msra.mxu1 %v145_v20  ;;  %v246_v33 = vld [vmem:[%s404_s2] ss:$0 sm:$0xff]  ;;  %212 = vmatpush.msra.mxu2 %v207_v49  ;;  %v205_v51 = vld [vmem:[#allocation6 + $0x68] sm:$0xff]  ;;  %v203_v53 = vld [vmem:[#allocation6 + $0x58] sm:$0xff] }
  0x1a   :  { %100 = vmatpush.msra.mxu0 %v83_v6  ;;  %v204_v52 = vld [vmem:[#allocation6 + $0x60] sm:$0xff]  ;;  %v202_v54 = vld [vmem:[#allocation6 + $0x50] sm:$0xff]  ;;  %v201_v55 = vld [vmem:[#allocation6 + $0x48] sm:$0xff] }
  0x1b   :  { %157 = vmatpush.msra.mxu1 %v144_v21  ;;  %213 = vmatpush.msra.mxu2 %v206_v50  ;;  %v200_v56 = vld [vmem:[#allocation6 + $0x40] sm:$0xff]  ;;  %v199_v57 = vld [vmem:[#allocation6 + $0x38] sm:$0xff]  ;;  %v198_v58 = vld [vmem:[#allocation6 + $0x30] sm:$0xff] }
  0x1c   :  { %101 = vmatpush.msra.mxu0 %v82_v7  ;;  %v197_v59 = vld [vmem:[#allocation6 + $0x28] sm:$0xff]  ;;  %v196_v60 = vld [vmem:[#allocation6 + $0x20] sm:$0xff]  ;;  %v195_v61 = vld [vmem:[#allocation6 + $0x18] sm:$0xff] }
  0x1d   :  { %158 = vmatpush.msra.mxu1 %v143_v22  ;;  %214 = vmatpush.msra.mxu2 %v205_v51  ;;  %v194_v62 = vld [vmem:[#allocation6 + $0x10] sm:$0xff]  ;;  %v193_v63 = vld [vmem:[#allocation6 + $0x8] sm:$0xff]  ;;  %v192_v0 = vld [vmem:[#allocation6] sm:$0xff] }
  0x1e   :  { %102 = vmatpush.msra.mxu0 %v81_v8  ;;  %v247_v1 = vld [vmem:[%s406_s4] ss:$0 sm:$0xff] }
  0x1f   :  { %159 = vmatpush.msra.mxu1 %v142_v23  ;;  %215 = vmatpush.msra.mxu2 %v204_v52  ;;  %v248_v17 = vld [vmem:[%s408_s6] ss:$0 sm:$0xff] }
  0x20   :  { %103 = vmatpush.msra.mxu0 %v80_v9 }
  0x21   :  { %160 = vmatpush.msra.mxu1 %v141_v24  ;;  %216 = vmatpush.msra.mxu2 %v203_v53 }
  0x22   :  { %104 = vmatpush.msra.mxu0 %v79_v10 }
  0x23   :  { %161 = vmatpush.msra.mxu1 %v140_v25  ;;  %217 = vmatpush.msra.mxu2 %v202_v54 }
  0x24   :  { %105 = vmatpush.msra.mxu0 %v78_v11 }
  0x25   :  { %162 = vmatpush.msra.mxu1 %v139_v26  ;;  %218 = vmatpush.msra.mxu2 %v201_v55 }
  0x26   :  { %106 = vmatpush.msra.mxu0 %v77_v12 }
  0x27   :  { %163 = vmatpush.msra.mxu1 %v138_v27  ;;  %219 = vmatpush.msra.mxu2 %v200_v56 }
  0x28   :  { %107 = vmatpush.msra.mxu0 %v76_v13 }
  0x29   :  { %164 = vmatpush.msra.mxu1 %v137_v28  ;;  %220 = vmatpush.msra.mxu2 %v199_v57 }
  0x2a   :  { %108 = vmatpush.msra.mxu0 %v75_v14 }
  0x2b   :  { %165 = vmatpush.msra.mxu1 %v136_v29  ;;  %221 = vmatpush.msra.mxu2 %v198_v58 }
  0x2c   :  { %109 = vmatpush.msra.mxu0 %v74_v15 }
  0x2d   :  { %110 = vmatmul.f32.vlgmr.msra.gmra.mxu0 %v73_v16  ;;  %166 = vmatpush.msra.mxu1 %v135_v30 }
  0x2e   :  { %222 = vmatpush.msra.mxu2 %v197_v59 }
  0x2f   :  { %167 = vmatpush.msra.mxu1 %v134_v31 }
  0x30   :  { %223 = vmatpush.msra.mxu2 %v196_v60 }
  0x31   :  { %168 = vmatpush.msra.mxu1 %v133_v32 }
  0x32   :  { %224 = vmatpush.msra.mxu2 %v195_v61 }
  0x34   :  { %225 = vmatpush.msra.mxu2 %v194_v62 }
  0x36   :  { %226 = vmatpush.msra.mxu2 %v193_v63 }
  0x38   :  { %227 = vmatpush.msra.mxu2 %v192_v0 }
  0xaa   :  { %v111_v34 = vpop.f32.mrf.mxu0 }
  0xab   :  { %v112_v35 = vadd.f32 %v246_v33, %v111_v34 }
  0xad   :  { %v239_v36 = vmul.f32 -1.442695, %v112_v35 }
  0xaf   :  { %249 = vpow2.f32 %v239_v36 }
  0xb5   :  { %v250_v37 = vpop.eup %249 }
  0xb6   :  { %v117_v38 = vadd.f32 1.0, %v250_v37 }
  0xb8   :  { %251 = vrcp.f32 %v117_v38  ;;  %v129_v42 = vand.u32 2147483648, %v117_v38  ;;  %v127_v44 = vand.u32 2147483647, %v117_v38  ;;  %vm123_vm1 = vweird.f32 %v117_v38 }
  0xba   :  { %v130_v46 = vor.u32 1.1754944e-38, %v129_v42  ;;  %vm128_vm3 = vcmp.eq.f32.partialorder %v127_v44, 8.507059e+37 }
  0xbe   :  { %v252_v39 = vpop.eup %251 }
  0xbf   :  { %v119_v40 = vmul.f32 %v252_v39, %v117_v38  ;;  %vm124_vm0 = vweird.f32 %v252_v39 }
  0xc0   :  { %vm125_vm2 = vmor %vm123_vm1, %vm124_vm0 }
  0xc1   :  { %v120_v41 = vsub.f32 1.0, %v119_v40 }
  0xc3   :  { %v121_v43 = vmul.f32 %v252_v39, %v120_v41 }
  0xc5   :  { %v122_v45 = vadd.f32 %v252_v39, %v121_v43 }
  0xc7   :  { %v126_v47 = vsel %vm125_vm2, %v252_v39, %v122_v45 }
  0xc8   :  { %v131_v48 = vsel %vm128_vm3, %v130_v46, %v126_v47 }
  0xc9   :  { %169 = vmatmul.f32.vlgmr.msra.gmra.mxu1 %v131_v48 }
 0x146   :  { %v170_v2 = vpop.f32.mrf.mxu1 }
 0x147   :  { %v171_v3 = vadd.f32 %v247_v1, %v170_v2 }
 0x149   :  { %v240_v4 = vmul.f32 -1.442695, %v171_v3 }
 0x14b   :  { %253 = vpow2.f32 %v240_v4 }
 0x151   :  { %v254_v5 = vpop.eup %253 }
 0x152   :  { %v176_v6 = vadd.f32 1.0, %v254_v5 }
 0x154   :  { %255 = vrcp.f32 %v176_v6  ;;  %v188_v10 = vand.u32 2147483648, %v176_v6  ;;  %v186_v12 = vand.u32 2147483647, %v176_v6  ;;  %vm182_vm5 = vweird.f32 %v176_v6 }
 0x156   :  { %v189_v14 = vor.u32 1.1754944e-38, %v188_v10  ;;  %vm187_vm7 = vcmp.eq.f32.partialorder %v186_v12, 8.507059e+37 }
 0x15a   :  { %v256_v7 = vpop.eup %255 }
 0x15b   :  { %v178_v8 = vmul.f32 %v256_v7, %v176_v6  ;;  %vm183_vm4 = vweird.f32 %v256_v7 }
 0x15c   :  { %vm184_vm6 = vmor %vm182_vm5, %vm183_vm4 }
 0x15d   :  { %v179_v9 = vsub.f32 1.0, %v178_v8 }
 0x15f   :  { %v180_v11 = vmul.f32 %v256_v7, %v179_v9 }
 0x161   :  { %v181_v13 = vadd.f32 %v256_v7, %v180_v11 }
 0x163   :  { %v185_v15 = vsel %vm184_vm6, %v256_v7, %v181_v13 }
 0x164   :  { %v190_v16 = vsel %vm187_vm7, %v189_v14, %v185_v15 }
 0x165   :  { %228 = vmatmul.f32.vlgmr.msra.gmra.mxu2 %v190_v16 }
 0x1e8   :  { %v229_v18 = vpop.f32.mrf.mxu2 }
 0x1e9   :  { %v230_v19 = vadd.f32 %v248_v17, %v229_v18 }
 0x1eb   :  { %232 = vst [vmem:[%s409_s7] sm:$0xff] %v230_v19 }
 0x1ec   :  { %237 = vsyncpa [#allocation3], 1 }
 0x1ed   :  { %238 = vsyncpa [#allocation5], 1 }

</bundles_post_ra>
